<compile_context>
chip_gen: v5e
topology: v5e:2x2
jax: 0.10.0
libtpu: 0.0.40
codegen_flags: <defaults>
</compile_context>

<pallas_src>
import functools

import jax
import jax.numpy as jnp
from jax.experimental import pallas as pl
from jax.experimental.pallas import tpu as pltpu


# --------------------------- per-chip VMEM limit ----------------------------

@functools.lru_cache(maxsize=None)
def _vmem_limit_bytes():
    """~100 MiB on 128-MiB VMEM parts (v5e/v6e), ~51 MiB on v7x (64 MiB)."""
    try:
        cap = int(pltpu.get_tpu_info().vmem_capacity_bytes)
    except Exception:  # conservative fallback if the query is unavailable
        cap = 64 * 1024 * 1024
    return max(32 * 1024 * 1024, min(100 * 1024 * 1024, (cap * 4) // 5))


# ----------------------------- in-kernel math -------------------------------

def _erf(x):
    # Abramowitz & Stegun 7.1.26 polynomial (|err| ~ 1.5e-7); divide -> EUP.
    a1, a2, a3, a4, a5 = 0.254829592, -0.284496736, 1.421413741, -1.453152027, 1.061405429
    p = 0.3275911
    sign = jnp.where(x >= 0.0, 1.0, -1.0)
    xa = jnp.abs(x)
    t = pl.reciprocal(1.0 + p * xa, approx=True)
    poly = ((((a5 * t + a4) * t + a3) * t + a2) * t + a1) * t
    return sign * (1.0 - poly * jnp.exp(-xa * xa))


def _gelu_exact(x):
    return 0.5 * x * (1.0 + _erf(x * (1.0 / (2.0 ** 0.5))))


def _layer_norm(x, g, b, eps):
    mu = jnp.mean(x, axis=-1, keepdims=True)
    var = jnp.mean((x - mu) * (x - mu), axis=-1, keepdims=True)
    return (x - mu) * jax.lax.rsqrt(var + eps) * g + b


# ------------------------------ Pallas kernels -------------------------------

def _qkv_kernel(x_ref, wqkv_ref, bqkv_ref, qkv_ref):
    """Fused Q/K/V projection for one (batch, seq-tile), written HEAD-MAJOR.

    wqkv_ref: (3*nh, H, hd) bf16 (Q rows pre-scaled by 1/sqrt(hd))
    bqkv_ref: (3*nh, 1, hd) f32
    qkv_ref : (1, 3*nh, tile, hd) bf16 output block
    """
    x = x_ref[0].astype(jnp.bfloat16)                                   # (T1, H)
    n = wqkv_ref.shape[0]
    for j in range(n):                                                  # unrolled
        y = jnp.dot(x, wqkv_ref[j], preferred_element_type=jnp.float32) + bqkv_ref[j]
        qkv_ref[0, j] = y.astype(jnp.bfloat16)


def _attn_ffn_kernel(q_ref, k_ref, v_ref, x_ref, m_ref,
                     woh_ref, w1_ref, b1_ref, w2_ref, vec_ref,
                     o_ref, *, eps):
    """Attention (all heads batched) + out-proj + LN + GELU FFN + LN for one
    (batch, query-tile).  Scale is already folded into Q."""
    q = q_ref[0]                                  # (nh, TQ, hd) bf16 (pre-scaled)
    k = k_ref[0]                                  # (nh, S,  hd) bf16
    v = v_ref[0]                                  # (nh, S,  hd) bf16
    x = x_ref[0]                                  # (TQ, H)      f32 residual
    mask = m_ref[0]                               # (1, S)       f32 additive mask

    # Scores for all heads in one batched MXU contraction, f32 accumulate.
    s = jnp.einsum("hqd,hkd->hqk", q, k, preferred_element_type=jnp.float32)
    s = s + mask[None, :, :]                      # (nh, TQ, S)

    # Softmax in f32; denominator reciprocal on the EUP.
    s = s - jnp.max(s, axis=-1, keepdims=True)
    e = jnp.exp(s)
    p = e * pl.reciprocal(jnp.sum(e, axis=-1, keepdims=True), approx=True)

    ctx = jnp.einsum("hqk,hkd->hqd", p.astype(jnp.bfloat16), v,
                     preferred_element_type=jnp.float32)                # (nh, TQ, hd)
    ctx_bf = ctx.astype(jnp.bfloat16)

    bo, g1, be1 = vec_ref[0], vec_ref[1], vec_ref[2]                    # each (1, H)
    b2, g2, be2 = vec_ref[3], vec_ref[4], vec_ref[5]

    # Output projection with the head reduction accumulated into a single f32
    # (TQ, H) accumulator (seeded with residual + bias) -- no (nh, TQ, H)
    # materialization, no VPU axis-0 reduce.
    acc = x + bo
    nh = q.shape[0]
    for h in range(nh):                                                 # unrolled
        acc = acc + jnp.dot(ctx_bf[h], woh_ref[h],
                            preferred_element_type=jnp.float32)
    h1 = _layer_norm(acc, g1, be1, eps)

    inter = jnp.dot(h1.astype(jnp.bfloat16), w1_ref[...],
                    preferred_element_type=jnp.float32) + b1_ref[...]
    inter = _gelu_exact(inter)
    ffn = jnp.dot(inter.astype(jnp.bfloat16), w2_ref[...],
                  preferred_element_type=jnp.float32) + b2
    o_ref[0] = _layer_norm(ffn + h1, g2, be2, eps).astype(o_ref.dtype)


# ------------------------------ layer wrapper --------------------------------

def _bert_layer(x, add_mask, lp, *, num_heads, tq, ts1, eps, vmem_limit):
    B, S_pad, H = x.shape
    hd = H // num_heads
    I = lp["w1"].shape[1]
    nh3 = 3 * num_heads

    def rep(shape):
        zeros = (0,) * len(shape)
        return pl.BlockSpec(shape, lambda b, i, _z=zeros: _z)

    cparams = pltpu.CompilerParams(
        dimension_semantics=("parallel", "parallel"),
        vmem_limit_bytes=vmem_limit)

    # ---- pass 1: fused Q/K/V projection, head-major output, seq tile ts1 ----
    qkv = pl.pallas_call(
        _qkv_kernel,
        grid=(B, S_pad // ts1),
        in_specs=[
            pl.BlockSpec((1, ts1, H), lambda b, i: (b, i, 0)),          # x tile
            rep((nh3, H, hd)),                                          # wqkv (bf16)
            rep((nh3, 1, hd)),                                          # bqkv (f32)
        ],
        out_specs=pl.BlockSpec((1, nh3, ts1, hd), lambda b, i: (b, 0, i, 0)),
        out_shape=jax.ShapeDtypeStruct((B, nh3, S_pad, hd), jnp.bfloat16),
        compiler_params=cparams,
    )(x, lp["wqkv"], lp["bqkv"])

    # ---- pass 2: attention + out-proj + LN + FFN + LN over query tiles ------
    # Q / K / V are three BlockSpec views of the SAME head-major buffer
    # (head-block index 0 / 1 / 2), so no HBM relayout happens between passes.
    kernel = functools.partial(_attn_ffn_kernel, eps=eps)
    return pl.pallas_call(
        kernel,
        grid=(B, S_pad // tq),
        in_specs=[
            pl.BlockSpec((1, num_heads, tq, hd), lambda b, i: (b, 0, i, 0)),     # Q tile
            pl.BlockSpec((1, num_heads, S_pad, hd), lambda b, i: (b, 1, 0, 0)),  # K (full S)
            pl.BlockSpec((1, num_heads, S_pad, hd), lambda b, i: (b, 2, 0, 0)),  # V (full S)
            pl.BlockSpec((1, tq, H), lambda b, i: (b, i, 0)),                    # residual x
            pl.BlockSpec((1, 1, S_pad), lambda b, i: (b, 0, 0)),                 # additive mask
            rep((num_heads, hd, H)),                                             # wo head-major
            rep((H, I)), rep((1, I)),                                            # w1, b1
            rep((I, H)),                                                         # w2
            rep((6, 1, H)),                                                      # bo,g1,be1,b2,g2,be2
        ],
        out_specs=pl.BlockSpec((1, tq, H), lambda b, i: (b, i, 0)),
        out_shape=jax.ShapeDtypeStruct((B, S_pad, H), x.dtype),
        compiler_params=cparams,
    )(qkv, qkv, qkv, x, add_mask, lp["woh"], lp["w1"], lp["b1"], lp["w2"], lp["vecs"])


# ------------------------------ encoder wrapper ------------------------------

def prepare_params(params, num_heads):
    """One-time (model-load) weight prep: bf16 casts, fused head-major Q/K/V
    stacking, 1/sqrt(hd) folded into Q, wo reshaped head-major, vectors stacked.
    Hoisted out of the forward pass (perf feedback)."""
    prepped = []
    for lp in params:
        H = lp["wq"].shape[0]
        assert H % num_heads == 0
        hd = H // num_heads
        scale = 1.0 / (float(hd) ** 0.5)

        def head_major_w(w):            # (H, H) -> (nh, H, hd)
            return w.reshape(H, num_heads, hd).transpose(1, 0, 2)

        def head_major_b(b):            # (1, H) -> (nh, 1, hd)
            return b.reshape(num_heads, 1, hd)

        wqkv = jnp.concatenate(
            [head_major_w(lp["wq"] * scale), head_major_w(lp["wk"]),
             head_major_w(lp["wv"])], axis=0).astype(jnp.bfloat16)       # (3nh,H,hd)
        bqkv = jnp.concatenate(
            [head_major_b(lp["bq"] * scale), head_major_b(lp["bk"]),
             head_major_b(lp["bv"])], axis=0)                            # (3nh,1,hd) f32

        prepped.append(dict(
            wqkv=wqkv,
            bqkv=bqkv,
            woh=lp["wo"].reshape(num_heads, hd, H).astype(jnp.bfloat16),
            w1=lp["w1"].astype(jnp.bfloat16),
            b1=lp["b1"],                                                 # (1,I) f32
            w2=lp["w2"].astype(jnp.bfloat16),
            vecs=jnp.stack([lp["bo"], lp["g1"], lp["be1"],
                            lp["b2"], lp["g2"], lp["be2"]], axis=0),     # (6,1,H) f32
        ))
    return prepped


def my_bert_encoder(hidden_state, prepped_params, attention_mask=None, *,
                    num_heads, q_tile=128, eps=1e-12):
    """hidden_state: (B, S, H) f32; attention_mask: (B, S) (1 = keep, 0 = mask)."""
    B, S, H = hidden_state.shape
    assert H % num_heads == 0
    assert q_tile % 16 == 0

    if attention_mask is None:
        attention_mask = jnp.ones((B, S), hidden_state.dtype)

    # Query tile + padded sequence length (pad keys are masked out with -1e9,
    # pad query rows are sliced off at the end -> identical semantics).
    if S >= q_tile:
        tq = q_tile
        S_pad = -(-S // tq) * tq
    else:
        S_pad = -(-S // 16) * 16          # bf16 sublane packing
        tq = S_pad
    # Decoupled (larger) pass-1 sequence tile: pass 1 only holds small weights.
    ts1 = tq
    for cand in (512, 256, 128):
        if cand > tq and S_pad % cand == 0:
            ts1 = cand
            break

    x = hidden_state
    mask = attention_mask.astype(jnp.float32)
    if S_pad != S:
        x = jnp.pad(x, ((0, 0), (0, S_pad - S), (0, 0)))
        mask = jnp.pad(mask, ((0, 0), (0, S_pad - S)))   # pad keys -> masked

    # float32 branch of the PyTorch module: (1 - mask) * -1e9.
    add_mask = ((1.0 - mask) * -1000000000.0).reshape(B, 1, S_pad)

    vmem_limit = _vmem_limit_bytes()
    h = x
    for lp in prepped_params:
        h = _bert_layer(h, add_mask, lp, num_heads=num_heads,
                        tq=tq, ts1=ts1, eps=eps, vmem_limit=vmem_limit)
    return h[:, :S, :] if S_pad != S else h


# ---------------------------- pure-JAX reference -----------------------------

def _ref_layer(x, add_mask, lp, num_heads, eps):
    B, S, H = x.shape
    hd = H // num_heads

    def split_heads(t):
        return t.reshape(B, S, num_heads, hd).transpose(0, 2, 1, 3)

    q = split_heads(x @ lp["wq"] + lp["bq"])
    k = split_heads(x @ lp["wk"] + lp["bk"])
    v = split_heads(x @ lp["wv"] + lp["bv"])
    s = jnp.einsum("bhqd,bhkd->bhqk", q, k) / (float(hd) ** 0.5)
    s = s + add_mask[:, None, :, :]
    p = jax.nn.softmax(s, axis=-1)
    ctx = jnp.einsum("bhqk,bhkd->bhqd", p, v).transpose(0, 2, 1, 3).reshape(B, S, H)
    attn = ctx @ lp["wo"] + lp["bo"]
    h1 = _layer_norm(attn + x, lp["g1"], lp["be1"], eps)
    inter = jax.nn.gelu(h1 @ lp["w1"] + lp["b1"], approximate=False)
    ffn = inter @ lp["w2"] + lp["b2"]
    return _layer_norm(ffn + h1, lp["g2"], lp["be2"], eps)


def _ref_encoder(x, params, num_heads, attention_mask=None, eps=1e-12):
    B, S, _ = x.shape
    if attention_mask is None:
        attention_mask = jnp.ones((B, S), x.dtype)
    add_mask = ((1.0 - attention_mask.astype(x.dtype)) * -1000000000.0).reshape(B, 1, S)
    h = x
    for lp in params:
        h = _ref_layer(h, add_mask, lp, num_heads, eps)
    return h


# ------------------------------- param init ----------------------------------

def init_params(key, num_layers, H, I):
    params = []
    for layer in range(num_layers):
        ks = jax.random.split(jax.random.fold_in(key, layer), 12)
        n = lambda k, shape: 0.02 * jax.random.normal(k, shape, jnp.float32)
        params.append(dict(
            wq=n(ks[0], (H, H)), bq=n(ks[1], (1, H)),
            wk=n(ks[2], (H, H)), bk=n(ks[3], (1, H)),
            wv=n(ks[4], (H, H)), bv=n(ks[5], (1, H)),
            wo=n(ks[6], (H, H)), bo=n(ks[7], (1, H)),
            g1=jnp.ones((1, H), jnp.float32), be1=jnp.zeros((1, H), jnp.float32),
            w1=n(ks[8], (H, I)), b1=n(ks[9], (1, I)),
            w2=n(ks[10], (I, H)), b2=n(ks[11], (1, H)),
            g2=jnp.ones((1, H), jnp.float32), be2=jnp.zeros((1, H), jnp.float32),
        ))
    return params


# ---------------------------------- main --------------------------------------

if __name__ == "__main__":
    NUM_HEADS, NUM_LAYERS = 4, 2      # head_dim = 8
    H, I = 32, 64                      # hidden, intermediate

    key = jax.random.PRNGKey(0)
    kx1, kx2, kp = jax.random.split(key, 3)
    params = init_params(kp, NUM_LAYERS, H, I)
    prepped = prepare_params(params, NUM_HEADS)   # hoisted one-time weight prep

    # bf16 matmuls inside the kernel -> loosened tolerance vs f32 reference.
    RTOL = ATOL = 3e-2

    # Case 1: B=2, S=16, default mask (None -> all ones); single query tile.
    x1 = jax.random.normal(kx1, (2, 16, H), jnp.float32)
    out1 = jax.block_until_ready(my_bert_encoder(x1, prepped, num_heads=NUM_HEADS))
    ref1 = _ref_encoder(x1, params, NUM_HEADS)
    assert out1.shape == x1.shape
    assert bool(jnp.all(jnp.isfinite(out1)))
    assert bool(jnp.allclose(out1, ref1, rtol=RTOL, atol=ATOL)), \
        float(jnp.max(jnp.abs(out1 - ref1)))

    # Case 2: B=2, S=48 with q_tile=32 -> padded to S_pad=64, two query tiles,
    # plus an explicit padding mask on the second sequence.
    x2 = jax.random.normal(kx2, (2, 48, H), jnp.float32)
    am = jnp.ones((2, 48), jnp.float32).at[1, 24:].set(0.0)
    out2 = jax.block_until_ready(
        my_bert_encoder(x2, prepped, attention_mask=am,
                        num_heads=NUM_HEADS, q_tile=32))
    ref2 = _ref_encoder(x2, params, NUM_HEADS, attention_mask=am)
    assert out2.shape == x2.shape
    assert bool(jnp.all(jnp.isfinite(out2)))
    assert bool(jnp.allclose(out2, ref2, rtol=RTOL, atol=ATOL)), \
        float(jnp.max(jnp.abs(out2 - ref2)))

    print("KERNEL_OK")
</pallas_src>

<mosaic_0001>
module attributes {stable_mosaic.version = 11 : i64} {
  func.func @_qkv_kernel(%arg0: i32, %arg1: i32, %arg2: memref<1x16x32xf32, #tpu.memory_space<vmem>>, %arg3: memref<12x32x8xbf16, #tpu.memory_space<vmem>>, %arg4: memref<12x1x8xf32, #tpu.memory_space<vmem>>, %arg5: memref<1x12x16x8xbf16, #tpu.memory_space<vmem>>) attributes {dimension_semantics = [#tpu.dimension_semantics<parallel>, #tpu.dimension_semantics<parallel>], iteration_bounds = array<i64: 2, 1>, scalar_prefetch = 0 : i64, scratch_operands = 0 : i64, tpu.core_type = #tpu.core_type<tc>, window_params = [{transform_indices = @transform_0, window_bounds = array<i64: 1, 16, 32>}, {pipeline_mode = #tpu.pipeline_mode<synchronous>, transform_indices = @transform_1, window_bounds = array<i64: 12, 32, 8>}, {pipeline_mode = #tpu.pipeline_mode<synchronous>, transform_indices = @transform_2, window_bounds = array<i64: 12, 1, 8>}, {transform_indices = @transform_3, window_bounds = array<i64: 1, 12, 16, 8>}]} {
    %c0 = arith.constant 0 : index
    %c0_0 = arith.constant 0 : index
    %c0_1 = arith.constant 0 : index
    %0 = vector.load %arg2[%c0, %c0_0, %c0_1] : memref<1x16x32xf32, #tpu.memory_space<vmem>>, vector<1x16x32xf32>
    %1 = vector.shape_cast %0 : vector<1x16x32xf32> to vector<16x32xf32>
    %2 = arith.truncf %1 : vector<16x32xf32> to vector<16x32xbf16>
    %c0_2 = arith.constant 0 : index
    %c0_3 = arith.constant 0 : index
    %c0_4 = arith.constant 0 : index
    %3 = vector.load %arg3[%c0_2, %c0_3, %c0_4] : memref<12x32x8xbf16, #tpu.memory_space<vmem>>, vector<1x32x8xbf16>
    %4 = vector.shape_cast %3 : vector<1x32x8xbf16> to vector<32x8xbf16>
    %cst = arith.constant dense<0.000000e+00> : vector<16x8xf32>
    %5 = tpu.matmul %2, %4, %cst {dimension_numbers = #tpu.dot_dimension_numbers<[1], [0], [0], [1], [0, 0, 1, 1], [], []>} : vector<16x32xbf16>, vector<32x8xbf16>, vector<16x8xf32> -> vector<16x8xf32>
    %c0_5 = arith.constant 0 : index
    %c0_6 = arith.constant 0 : index
    %c0_7 = arith.constant 0 : index
    %6 = vector.load %arg4[%c0_5, %c0_6, %c0_7] : memref<12x1x8xf32, #tpu.memory_space<vmem>>, vector<1x1x8xf32>
    %7 = vector.shape_cast %6 : vector<1x1x8xf32> to vector<1x8xf32>
    %8 = vector.broadcast %7 : vector<1x8xf32> to vector<16x8xf32>
    %9 = arith.addf %5, %8 : vector<16x8xf32>
    %10 = arith.truncf %9 : vector<16x8xf32> to vector<16x8xbf16>
    %c0_8 = arith.constant 0 : index
    %c0_9 = arith.constant 0 : index
    %c0_10 = arith.constant 0 : index
    %c0_11 = arith.constant 0 : index
    %11 = vector.load %arg5[%c0_8, %c0_9, %c0_10, %c0_11] : memref<1x12x16x8xbf16, #tpu.memory_space<vmem>>, vector<1x1x16x8xbf16>
    %12 = vector.shape_cast %11 : vector<1x1x16x8xbf16> to vector<16x8xbf16>
    %13 = vector.shape_cast %10 : vector<16x8xbf16> to vector<1x1x16x8xbf16>
    tpu.vector_store %arg5[%c0_8, %c0_9, %c0_10, %c0_11], %13 {strides = array<i32>} : memref<1x12x16x8xbf16, #tpu.memory_space<vmem>>, vector<1x1x16x8xbf16>,
    %c1 = arith.constant 1 : index
    %c0_12 = arith.constant 0 : index
    %c0_13 = arith.constant 0 : index
    %14 = vector.load %arg3[%c1, %c0_12, %c0_13] : memref<12x32x8xbf16, #tpu.memory_space<vmem>>, vector<1x32x8xbf16>
    %15 = vector.shape_cast %14 : vector<1x32x8xbf16> to vector<32x8xbf16>
    %cst_14 = arith.constant dense<0.000000e+00> : vector<16x8xf32>
    %16 = tpu.matmul %2, %15, %cst_14 {dimension_numbers = #tpu.dot_dimension_numbers<[1], [0], [0], [1], [0, 0, 1, 1], [], []>} : vector<16x32xbf16>, vector<32x8xbf16>, vector<16x8xf32> -> vector<16x8xf32>
    %c1_15 = arith.constant 1 : index
    %c0_16 = arith.constant 0 : index
    %c0_17 = arith.constant 0 : index
    %17 = vector.load %arg4[%c1_15, %c0_16, %c0_17] : memref<12x1x8xf32, #tpu.memory_space<vmem>>, vector<1x1x8xf32>
    %18 = vector.shape_cast %17 : vector<1x1x8xf32> to vector<1x8xf32>
    %19 = vector.broadcast %18 : vector<1x8xf32> to vector<16x8xf32>
    %20 = arith.addf %16, %19 : vector<16x8xf32>
    %21 = arith.truncf %20 : vector<16x8xf32> to vector<16x8xbf16>
    %c0_18 = arith.constant 0 : index
    %c1_19 = arith.constant 1 : index
    %c0_20 = arith.constant 0 : index
    %c0_21 = arith.constant 0 : index
    %22 = vector.load %arg5[%c0_18, %c1_19, %c0_20, %c0_21] : memref<1x12x16x8xbf16, #tpu.memory_space<vmem>>, vector<1x1x16x8xbf16>
    %23 = vector.shape_cast %22 : vector<1x1x16x8xbf16> to vector<16x8xbf16>
    %24 = vector.shape_cast %21 : vector<16x8xbf16> to vector<1x1x16x8xbf16>
    tpu.vector_store %arg5[%c0_18, %c1_19, %c0_20, %c0_21], %24 {strides = array<i32>} : memref<1x12x16x8xbf16, #tpu.memory_space<vmem>>, vector<1x1x16x8xbf16>,
    %c2 = arith.constant 2 : index
    %c0_22 = arith.constant 0 : index
    %c0_23 = arith.constant 0 : index
    %25 = vector.load %arg3[%c2, %c0_22, %c0_23] : memref<12x32x8xbf16, #tpu.memory_space<vmem>>, vector<1x32x8xbf16>
    %26 = vector.shape_cast %25 : vector<1x32x8xbf16> to vector<32x8xbf16>
    %cst_24 = arith.constant dense<0.000000e+00> : vector<16x8xf32>
    %27 = tpu.matmul %2, %26, %cst_24 {dimension_numbers = #tpu.dot_dimension_numbers<[1], [0], [0], [1], [0, 0, 1, 1], [], []>} : vector<16x32xbf16>, vector<32x8xbf16>, vector<16x8xf32> -> vector<16x8xf32>
    %c2_25 = arith.constant 2 : index
    %c0_26 = arith.constant 0 : index
    %c0_27 = arith.constant 0 : index
    %28 = vector.load %arg4[%c2_25, %c0_26, %c0_27] : memref<12x1x8xf32, #tpu.memory_space<vmem>>, vector<1x1x8xf32>
    %29 = vector.shape_cast %28 : vector<1x1x8xf32> to vector<1x8xf32>
    %30 = vector.broadcast %29 : vector<1x8xf32> to vector<16x8xf32>
    %31 = arith.addf %27, %30 : vector<16x8xf32>
    %32 = arith.truncf %31 : vector<16x8xf32> to vector<16x8xbf16>
    %c0_28 = arith.constant 0 : index
    %c2_29 = arith.constant 2 : index
    %c0_30 = arith.constant 0 : index
    %c0_31 = arith.constant 0 : index
    %33 = vector.load %arg5[%c0_28, %c2_29, %c0_30, %c0_31] : memref<1x12x16x8xbf16, #tpu.memory_space<vmem>>, vector<1x1x16x8xbf16>
    %34 = vector.shape_cast %33 : vector<1x1x16x8xbf16> to vector<16x8xbf16>
    %35 = vector.shape_cast %32 : vector<16x8xbf16> to vector<1x1x16x8xbf16>
    tpu.vector_store %arg5[%c0_28, %c2_29, %c0_30, %c0_31], %35 {strides = array<i32>} : memref<1x12x16x8xbf16, #tpu.memory_space<vmem>>, vector<1x1x16x8xbf16>,
    %c3 = arith.constant 3 : index
    %c0_32 = arith.constant 0 : index
    %c0_33 = arith.constant 0 : index
    %36 = vector.load %arg3[%c3, %c0_32, %c0_33] : memref<12x32x8xbf16, #tpu.memory_space<vmem>>, vector<1x32x8xbf16>
    %37 = vector.shape_cast %36 : vector<1x32x8xbf16> to vector<32x8xbf16>
    %cst_34 = arith.constant dense<0.000000e+00> : vector<16x8xf32>
    %38 = tpu.matmul %2, %37, %cst_34 {dimension_numbers = #tpu.dot_dimension_numbers<[1], [0], [0], [1], [0, 0, 1, 1], [], []>} : vector<16x32xbf16>, vector<32x8xbf16>, vector<16x8xf32> -> vector<16x8xf32>
    %c3_35 = arith.constant 3 : index
    %c0_36 = arith.constant 0 : index
    %c0_37 = arith.constant 0 : index
    %39 = vector.load %arg4[%c3_35, %c0_36, %c0_37] : memref<12x1x8xf32, #tpu.memory_space<vmem>>, vector<1x1x8xf32>
    %40 = vector.shape_cast %39 : vector<1x1x8xf32> to vector<1x8xf32>
    %41 = vector.broadcast %40 : vector<1x8xf32> to vector<16x8xf32>
    %42 = arith.addf %38, %41 : vector<16x8xf32>
    %43 = arith.truncf %42 : vector<16x8xf32> to vector<16x8xbf16>
    %c0_38 = arith.constant 0 : index
    %c3_39 = arith.constant 3 : index
    %c0_40 = arith.constant 0 : index
    %c0_41 = arith.constant 0 : index
    %44 = vector.load %arg5[%c0_38, %c3_39, %c0_40, %c0_41] : memref<1x12x16x8xbf16, #tpu.memory_space<vmem>>, vector<1x1x16x8xbf16>
    %45 = vector.shape_cast %44 : vector<1x1x16x8xbf16> to vector<16x8xbf16>
    %46 = vector.shape_cast %43 : vector<16x8xbf16> to vector<1x1x16x8xbf16>
    tpu.vector_store %arg5[%c0_38, %c3_39, %c0_40, %c0_41], %46 {strides = array<i32>} : memref<1x12x16x8xbf16, #tpu.memory_space<vmem>>, vector<1x1x16x8xbf16>,
    %c4 = arith.constant 4 : index
    %c0_42 = arith.constant 0 : index
    %c0_43 = arith.constant 0 : index
    %47 = vector.load %arg3[%c4, %c0_42, %c0_43] : memref<12x32x8xbf16, #tpu.memory_space<vmem>>, vector<1x32x8xbf16>
    %48 = vector.shape_cast %47 : vector<1x32x8xbf16> to vector<32x8xbf16>
    %cst_44 = arith.constant dense<0.000000e+00> : vector<16x8xf32>
    %49 = tpu.matmul %2, %48, %cst_44 {dimension_numbers = #tpu.dot_dimension_numbers<[1], [0], [0], [1], [0, 0, 1, 1], [], []>} : vector<16x32xbf16>, vector<32x8xbf16>, vector<16x8xf32> -> vector<16x8xf32>
    %c4_45 = arith.constant 4 : index
    %c0_46 = arith.constant 0 : index
    %c0_47 = arith.constant 0 : index
    %50 = vector.load %arg4[%c4_45, %c0_46, %c0_47] : memref<12x1x8xf32, #tpu.memory_space<vmem>>, vector<1x1x8xf32>
    %51 = vector.shape_cast %50 : vector<1x1x8xf32> to vector<1x8xf32>
    %52 = vector.broadcast %51 : vector<1x8xf32> to vector<16x8xf32>
    %53 = arith.addf %49, %52 : vector<16x8xf32>
    %54 = arith.truncf %53 : vector<16x8xf32> to vector<16x8xbf16>
    %c0_48 = arith.constant 0 : index
    %c4_49 = arith.constant 4 : index
    %c0_50 = arith.constant 0 : index
    %c0_51 = arith.constant 0 : index
    %55 = vector.load %arg5[%c0_48, %c4_49, %c0_50, %c0_51] : memref<1x12x16x8xbf16, #tpu.memory_space<vmem>>, vector<1x1x16x8xbf16>
    %56 = vector.shape_cast %55 : vector<1x1x16x8xbf16> to vector<16x8xbf16>
    %57 = vector.shape_cast %54 : vector<16x8xbf16> to vector<1x1x16x8xbf16>
    tpu.vector_store %arg5[%c0_48, %c4_49, %c0_50, %c0_51], %57 {strides = array<i32>} : memref<1x12x16x8xbf16, #tpu.memory_space<vmem>>, vector<1x1x16x8xbf16>,
    %c5 = arith.constant 5 : index
    %c0_52 = arith.constant 0 : index
    %c0_53 = arith.constant 0 : index
    %58 = vector.load %arg3[%c5, %c0_52, %c0_53] : memref<12x32x8xbf16, #tpu.memory_space<vmem>>, vector<1x32x8xbf16>
    %59 = vector.shape_cast %58 : vector<1x32x8xbf16> to vector<32x8xbf16>
    %cst_54 = arith.constant dense<0.000000e+00> : vector<16x8xf32>
    %60 = tpu.matmul %2, %59, %cst_54 {dimension_numbers = #tpu.dot_dimension_numbers<[1], [0], [0], [1], [0, 0, 1, 1], [], []>} : vector<16x32xbf16>, vector<32x8xbf16>, vector<16x8xf32> -> vector<16x8xf32>
    %c5_55 = arith.constant 5 : index
    %c0_56 = arith.constant 0 : index
    %c0_57 = arith.constant 0 : index
    %61 = vector.load %arg4[%c5_55, %c0_56, %c0_57] : memref<12x1x8xf32, #tpu.memory_space<vmem>>, vector<1x1x8xf32>
    %62 = vector.shape_cast %61 : vector<1x1x8xf32> to vector<1x8xf32>
    %63 = vector.broadcast %62 : vector<1x8xf32> to vector<16x8xf32>
    %64 = arith.addf %60, %63 : vector<16x8xf32>
    %65 = arith.truncf %64 : vector<16x8xf32> to vector<16x8xbf16>
    %c0_58 = arith.constant 0 : index
    %c5_59 = arith.constant 5 : index
    %c0_60 = arith.constant 0 : index
    %c0_61 = arith.constant 0 : index
    %66 = vector.load %arg5[%c0_58, %c5_59, %c0_60, %c0_61] : memref<1x12x16x8xbf16, #tpu.memory_space<vmem>>, vector<1x1x16x8xbf16>
    %67 = vector.shape_cast %66 : vector<1x1x16x8xbf16> to vector<16x8xbf16>
    %68 = vector.shape_cast %65 : vector<16x8xbf16> to vector<1x1x16x8xbf16>
    tpu.vector_store %arg5[%c0_58, %c5_59, %c0_60, %c0_61], %68 {strides = array<i32>} : memref<1x12x16x8xbf16, #tpu.memory_space<vmem>>, vector<1x1x16x8xbf16>,
    %c6 = arith.constant 6 : index
    %c0_62 = arith.constant 0 : index
    %c0_63 = arith.constant 0 : index
    %69 = vector.load %arg3[%c6, %c0_62, %c0_63] : memref<12x32x8xbf16, #tpu.memory_space<vmem>>, vector<1x32x8xbf16>
    %70 = vector.shape_cast %69 : vector<1x32x8xbf16> to vector<32x8xbf16>
    %cst_64 = arith.constant dense<0.000000e+00> : vector<16x8xf32>
    %71 = tpu.matmul %2, %70, %cst_64 {dimension_numbers = #tpu.dot_dimension_numbers<[1], [0], [0], [1], [0, 0, 1, 1], [], []>} : vector<16x32xbf16>, vector<32x8xbf16>, vector<16x8xf32> -> vector<16x8xf32>
    %c6_65 = arith.constant 6 : index
    %c0_66 = arith.constant 0 : index
    %c0_67 = arith.constant 0 : index
    %72 = vector.load %arg4[%c6_65, %c0_66, %c0_67] : memref<12x1x8xf32, #tpu.memory_space<vmem>>, vector<1x1x8xf32>
    %73 = vector.shape_cast %72 : vector<1x1x8xf32> to vector<1x8xf32>
    %74 = vector.broadcast %73 : vector<1x8xf32> to vector<16x8xf32>
    %75 = arith.addf %71, %74 : vector<16x8xf32>
    %76 = arith.truncf %75 : vector<16x8xf32> to vector<16x8xbf16>
    %c0_68 = arith.constant 0 : index
    %c6_69 = arith.constant 6 : index
    %c0_70 = arith.constant 0 : index
    %c0_71 = arith.constant 0 : index
    %77 = vector.load %arg5[%c0_68, %c6_69, %c0_70, %c0_71] : memref<1x12x16x8xbf16, #tpu.memory_space<vmem>>, vector<1x1x16x8xbf16>
    %78 = vector.shape_cast %77 : vector<1x1x16x8xbf16> to vector<16x8xbf16>
    %79 = vector.shape_cast %76 : vector<16x8xbf16> to vector<1x1x16x8xbf16>
    tpu.vector_store %arg5[%c0_68, %c6_69, %c0_70, %c0_71], %79 {strides = array<i32>} : memref<1x12x16x8xbf16, #tpu.memory_space<vmem>>, vector<1x1x16x8xbf16>,
    %c7 = arith.constant 7 : index
    %c0_72 = arith.constant 0 : index
    %c0_73 = arith.constant 0 : index
    %80 = vector.load %arg3[%c7, %c0_72, %c0_73] : memref<12x32x8xbf16, #tpu.memory_space<vmem>>, vector<1x32x8xbf16>
    %81 = vector.shape_cast %80 : vector<1x32x8xbf16> to vector<32x8xbf16>
    %cst_74 = arith.constant dense<0.000000e+00> : vector<16x8xf32>
    %82 = tpu.matmul %2, %81, %cst_74 {dimension_numbers = #tpu.dot_dimension_numbers<[1], [0], [0], [1], [0, 0, 1, 1], [], []>} : vector<16x32xbf16>, vector<32x8xbf16>, vector<16x8xf32> -> vector<16x8xf32>
    %c7_75 = arith.constant 7 : index
    %c0_76 = arith.constant 0 : index
    %c0_77 = arith.constant 0 : index
    %83 = vector.load %arg4[%c7_75, %c0_76, %c0_77] : memref<12x1x8xf32, #tpu.memory_space<vmem>>, vector<1x1x8xf32>
    %84 = vector.shape_cast %83 : vector<1x1x8xf32> to vector<1x8xf32>
    %85 = vector.broadcast %84 : vector<1x8xf32> to vector<16x8xf32>
    %86 = arith.addf %82, %85 : vector<16x8xf32>
    %87 = arith.truncf %86 : vector<16x8xf32> to vector<16x8xbf16>
    %c0_78 = arith.constant 0 : index
    %c7_79 = arith.constant 7 : index
    %c0_80 = arith.constant 0 : index
    %c0_81 = arith.constant 0 : index
    %88 = vector.load %arg5[%c0_78, %c7_79, %c0_80, %c0_81] : memref<1x12x16x8xbf16, #tpu.memory_space<vmem>>, vector<1x1x16x8xbf16>
    %89 = vector.shape_cast %88 : vector<1x1x16x8xbf16> to vector<16x8xbf16>
    %90 = vector.shape_cast %87 : vector<16x8xbf16> to vector<1x1x16x8xbf16>
    tpu.vector_store %arg5[%c0_78, %c7_79, %c0_80, %c0_81], %90 {strides = array<i32>} : memref<1x12x16x8xbf16, #tpu.memory_space<vmem>>, vector<1x1x16x8xbf16>,
    %c8 = arith.constant 8 : index
    %c0_82 = arith.constant 0 : index
    %c0_83 = arith.constant 0 : index
    %91 = vector.load %arg3[%c8, %c0_82, %c0_83] : memref<12x32x8xbf16, #tpu.memory_space<vmem>>, vector<1x32x8xbf16>
    %92 = vector.shape_cast %91 : vector<1x32x8xbf16> to vector<32x8xbf16>
    %cst_84 = arith.constant dense<0.000000e+00> : vector<16x8xf32>
    %93 = tpu.matmul %2, %92, %cst_84 {dimension_numbers = #tpu.dot_dimension_numbers<[1], [0], [0], [1], [0, 0, 1, 1], [], []>} : vector<16x32xbf16>, vector<32x8xbf16>, vector<16x8xf32> -> vector<16x8xf32>
    %c8_85 = arith.constant 8 : index
    %c0_86 = arith.constant 0 : index
    %c0_87 = arith.constant 0 : index
    %94 = vector.load %arg4[%c8_85, %c0_86, %c0_87] : memref<12x1x8xf32, #tpu.memory_space<vmem>>, vector<1x1x8xf32>
    %95 = vector.shape_cast %94 : vector<1x1x8xf32> to vector<1x8xf32>
    %96 = vector.broadcast %95 : vector<1x8xf32> to vector<16x8xf32>
    %97 = arith.addf %93, %96 : vector<16x8xf32>
    %98 = arith.truncf %97 : vector<16x8xf32> to vector<16x8xbf16>
    %c0_88 = arith.constant 0 : index
    %c8_89 = arith.constant 8 : index
    %c0_90 = arith.constant 0 : index
    %c0_91 = arith.constant 0 : index
    %99 = vector.load %arg5[%c0_88, %c8_89, %c0_90, %c0_91] : memref<1x12x16x8xbf16, #tpu.memory_space<vmem>>, vector<1x1x16x8xbf16>
    %100 = vector.shape_cast %99 : vector<1x1x16x8xbf16> to vector<16x8xbf16>
    %101 = vector.shape_cast %98 : vector<16x8xbf16> to vector<1x1x16x8xbf16>
    tpu.vector_store %arg5[%c0_88, %c8_89, %c0_90, %c0_91], %101 {strides = array<i32>} : memref<1x12x16x8xbf16, #tpu.memory_space<vmem>>, vector<1x1x16x8xbf16>,
    %c9 = arith.constant 9 : index
    %c0_92 = arith.constant 0 : index
    %c0_93 = arith.constant 0 : index
    %102 = vector.load %arg3[%c9, %c0_92, %c0_93] : memref<12x32x8xbf16, #tpu.memory_space<vmem>>, vector<1x32x8xbf16>
    %103 = vector.shape_cast %102 : vector<1x32x8xbf16> to vector<32x8xbf16>
    %cst_94 = arith.constant dense<0.000000e+00> : vector<16x8xf32>
    %104 = tpu.matmul %2, %103, %cst_94 {dimension_numbers = #tpu.dot_dimension_numbers<[1], [0], [0], [1], [0, 0, 1, 1], [], []>} : vector<16x32xbf16>, vector<32x8xbf16>, vector<16x8xf32> -> vector<16x8xf32>
    %c9_95 = arith.constant 9 : index
    %c0_96 = arith.constant 0 : index
    %c0_97 = arith.constant 0 : index
    %105 = vector.load %arg4[%c9_95, %c0_96, %c0_97] : memref<12x1x8xf32, #tpu.memory_space<vmem>>, vector<1x1x8xf32>
    %106 = vector.shape_cast %105 : vector<1x1x8xf32> to vector<1x8xf32>
    %107 = vector.broadcast %106 : vector<1x8xf32> to vector<16x8xf32>
    %108 = arith.addf %104, %107 : vector<16x8xf32>
    %109 = arith.truncf %108 : vector<16x8xf32> to vector<16x8xbf16>
    %c0_98 = arith.constant 0 : index
    %c9_99 = arith.constant 9 : index
    %c0_100 = arith.constant 0 : index
    %c0_101 = arith.constant 0 : index
    %110 = vector.load %arg5[%c0_98, %c9_99, %c0_100, %c0_101] : memref<1x12x16x8xbf16, #tpu.memory_space<vmem>>, vector<1x1x16x8xbf16>
    %111 = vector.shape_cast %110 : vector<1x1x16x8xbf16> to vector<16x8xbf16>
    %112 = vector.shape_cast %109 : vector<16x8xbf16> to vector<1x1x16x8xbf16>
    tpu.vector_store %arg5[%c0_98, %c9_99, %c0_100, %c0_101], %112 {strides = array<i32>} : memref<1x12x16x8xbf16, #tpu.memory_space<vmem>>, vector<1x1x16x8xbf16>,
    %c10 = arith.constant 10 : index
    %c0_102 = arith.constant 0 : index
    %c0_103 = arith.constant 0 : index
    %113 = vector.load %arg3[%c10, %c0_102, %c0_103] : memref<12x32x8xbf16, #tpu.memory_space<vmem>>, vector<1x32x8xbf16>
    %114 = vector.shape_cast %113 : vector<1x32x8xbf16> to vector<32x8xbf16>
    %cst_104 = arith.constant dense<0.000000e+00> : vector<16x8xf32>
    %115 = tpu.matmul %2, %114, %cst_104 {dimension_numbers = #tpu.dot_dimension_numbers<[1], [0], [0], [1], [0, 0, 1, 1], [], []>} : vector<16x32xbf16>, vector<32x8xbf16>, vector<16x8xf32> -> vector<16x8xf32>
    %c10_105 = arith.constant 10 : index
    %c0_106 = arith.constant 0 : index
    %c0_107 = arith.constant 0 : index
    %116 = vector.load %arg4[%c10_105, %c0_106, %c0_107] : memref<12x1x8xf32, #tpu.memory_space<vmem>>, vector<1x1x8xf32>
    %117 = vector.shape_cast %116 : vector<1x1x8xf32> to vector<1x8xf32>
    %118 = vector.broadcast %117 : vector<1x8xf32> to vector<16x8xf32>
    %119 = arith.addf %115, %118 : vector<16x8xf32>
    %120 = arith.truncf %119 : vector<16x8xf32> to vector<16x8xbf16>
    %c0_108 = arith.constant 0 : index
    %c10_109 = arith.constant 10 : index
    %c0_110 = arith.constant 0 : index
    %c0_111 = arith.constant 0 : index
    %121 = vector.load %arg5[%c0_108, %c10_109, %c0_110, %c0_111] : memref<1x12x16x8xbf16, #tpu.memory_space<vmem>>, vector<1x1x16x8xbf16>
    %122 = vector.shape_cast %121 : vector<1x1x16x8xbf16> to vector<16x8xbf16>
    %123 = vector.shape_cast %120 : vector<16x8xbf16> to vector<1x1x16x8xbf16>
    tpu.vector_store %arg5[%c0_108, %c10_109, %c0_110, %c0_111], %123 {strides = array<i32>} : memref<1x12x16x8xbf16, #tpu.memory_space<vmem>>, vector<1x1x16x8xbf16>,
    %c11 = arith.constant 11 : index
    %c0_112 = arith.constant 0 : index
    %c0_113 = arith.constant 0 : index
    %124 = vector.load %arg3[%c11, %c0_112, %c0_113] : memref<12x32x8xbf16, #tpu.memory_space<vmem>>, vector<1x32x8xbf16>
    %125 = vector.shape_cast %124 : vector<1x32x8xbf16> to vector<32x8xbf16>
    %cst_114 = arith.constant dense<0.000000e+00> : vector<16x8xf32>
    %126 = tpu.matmul %2, %125, %cst_114 {dimension_numbers = #tpu.dot_dimension_numbers<[1], [0], [0], [1], [0, 0, 1, 1], [], []>} : vector<16x32xbf16>, vector<32x8xbf16>, vector<16x8xf32> -> vector<16x8xf32>
    %c11_115 = arith.constant 11 : index
    %c0_116 = arith.constant 0 : index
    %c0_117 = arith.constant 0 : index
    %127 = vector.load %arg4[%c11_115, %c0_116, %c0_117] : memref<12x1x8xf32, #tpu.memory_space<vmem>>, vector<1x1x8xf32>
    %128 = vector.shape_cast %127 : vector<1x1x8xf32> to vector<1x8xf32>
    %129 = vector.broadcast %128 : vector<1x8xf32> to vector<16x8xf32>
    %130 = arith.addf %126, %129 : vector<16x8xf32>
    %131 = arith.truncf %130 : vector<16x8xf32> to vector<16x8xbf16>
    %c0_118 = arith.constant 0 : index
    %c11_119 = arith.constant 11 : index
    %c0_120 = arith.constant 0 : index
    %c0_121 = arith.constant 0 : index
    %132 = vector.load %arg5[%c0_118, %c11_119, %c0_120, %c0_121] : memref<1x12x16x8xbf16, #tpu.memory_space<vmem>>, vector<1x1x16x8xbf16>
    %133 = vector.shape_cast %132 : vector<1x1x16x8xbf16> to vector<16x8xbf16>
    %134 = vector.shape_cast %131 : vector<16x8xbf16> to vector<1x1x16x8xbf16>
    tpu.vector_store %arg5[%c0_118, %c11_119, %c0_120, %c0_121], %134 {strides = array<i32>} : memref<1x12x16x8xbf16, #tpu.memory_space<vmem>>, vector<1x1x16x8xbf16>,
    return
  }
  func.func @transform_0(%arg0: i32, %arg1: i32) -> (i32, i32, i32) {
    %c0_i32 = arith.constant 0 : i32
    %c0_i32_0 = arith.constant 0 : i32
    return %arg0, %arg1, %c0_i32 : i32, i32, i32
  }
  func.func @transform_1(%arg0: i32, %arg1: i32) -> (i32, i32, i32) {
    %c0_i32 = arith.constant 0 : i32
    %c0_i32_0 = arith.constant 0 : i32
    %c0_i32_1 = arith.constant 0 : i32
    %c0_i32_2 = arith.constant 0 : i32
    return %c0_i32, %c0_i32_0, %c0_i32_1 : i32, i32, i32
  }
  func.func @transform_2(%arg0: i32, %arg1: i32) -> (i32, i32, i32) {
    %c0_i32 = arith.constant 0 : i32
    %c0_i32_0 = arith.constant 0 : i32
    %c0_i32_1 = arith.constant 0 : i32
    %c0_i32_2 = arith.constant 0 : i32
    return %c0_i32, %c0_i32_0, %c0_i32_1 : i32, i32, i32
  }
  func.func @transform_3(%arg0: i32, %arg1: i32) -> (i32, i32, i32, i32) {
    %c0_i32 = arith.constant 0 : i32
    %c0_i32_0 = arith.constant 0 : i32
    %c0_i32_1 = arith.constant 0 : i32
    return %arg0, %c0_i32, %arg1, %c0_i32_0 : i32, i32, i32, i32
  }
}

</mosaic_0001>

<bundles_post_ra>
// kernel: tpu_custom_call.1
= control target key start
LH: loop header
LB: loop body
LE: loop exit
PB: predicated region body
PF: predicated region fallthrough
CT: control target
= control target key end

     0   :  { %s1096_s12 = smov 0   ;;  %s1098_s13 = smov 0   ;;  %s1303_s0 = inlined_call_operand.vmem [shape: f32[2,16,32], index: 0, kind: input, shape index: {}]   ;;  %s1304_s1 = inlined_call_operand.vmem [shape: bf16[12,32,8], index: 1, kind: input, shape index: {}]   ;;  %s1305_s2 = inlined_call_operand.vmem [shape: f32[12,1,8], index: 2, kind: input, shape index: {}]   ;;  %s1306_s3 = inlined_call_operand.vmem [shape: bf16[2,12,16,8], index: 3, kind: output, shape index: {}]  }
   0x1   :  { %s1100_s14 = smov 0  }
   0x2 LB: > { %s25_s15 = sadd.s32 1, %s1070_s13  ;;  %p799_p0 = scmp.ge.s32.totalorder %s1074_s14, 1  ;;  %s1074_s14 = sphi %s1100_s14, %s13_s14   ;;  %s1070_s13 = sphi %s1098_s13, %s1308_s13   ;;  %s1066_s12 = sphi %s1096_s12, %s1307_s12  }
   0x3   : > { %p27_p1 = scmp.ge.s32.totalorder %s25_s15, 2  ;;  %p158_p2 = scmp.lt.s32.totalorder %s1074_s14, 3 }
   0x5   : > { %s1310_s15 = smov (%p27_p1, %s25_s15), 0  ;;  %p159_p3 = pnand %p799_p0, %p158_p2 }
   0x6   : > { %p191_p4 = scmp.lt.s32.totalorder (!%p159_p3), %s1066_s12, 1 }
   0x7   : > { %162 = sbr.rel (%p159_p3) target bundleno = 199 (0xc7), region = 32 }
   0xc   : > { %v992_v0 = vld [vmem:[%s1304_s1 + $0x8] sm:$0xff]  ;;  %v994_v1 = vld [vmem:[%s1304_s1 + $0x18] sm:$0xff]  ;;  %v991_v4 = vld [vmem:[%s1304_s1] sm:$0xff]  ;;  %s1312_s12 = smov (!%p191_p4, %s1066_s12), 1  ;;  %vm234_vm0 = vcmask 261120   ;;  %vm254_vm1 = vcmask 60416  }
   0xd   : > { %v996_v2 = vld [vmem:[%s1304_s1 + $0x28] sm:$0xff]  ;;  %v998_v3 = vld [vmem:[%s1304_s1 + $0x38] sm:$0xff]  ;;  %244 = vmatpush.bf16.msra.mxu0 %v992_v0  ;;  %285 = vmatpush.bf16.msra.mxu1 %v994_v1  ;;  %v993_v5 = vld [vmem:[%s1304_s1 + $0x10] sm:$0xff]  ;;  %s990_s5 = sshll.u32 %s1312_s12, 4  ;;  %s1015_s26 = smul.u32 96, %s1312_s12 }
   0xe   : > { %326 = vmatpush.bf16.msra.mxu2 %v996_v2  ;;  %367 = vmatpush.bf16.msra.mxu3 %v998_v3  ;;  %v995_v6 = vld [vmem:[%s1304_s1 + $0x20] sm:$0xff]  ;;  %v997_v7 = vld [vmem:[%s1304_s1 + $0x30] sm:$0xff]  ;;  %v1004_v8 = vld [vmem:[%s1304_s1 + $0x68] sm:$0xff]  ;;  %s198_s16 = scalar_lea.vmem %s1303_s0, %s990_s5 }
   0xf   : > { %v1006_v9 = vld [vmem:[%s1304_s1 + $0x78] sm:$0xff]  ;;  %v211_v10 = vld [vmem:[%s198_s16] sm:$0xff]  ;;  %v212_v11 = vld [vmem:[%s198_s16 + $0x8] sm:$0xff]  ;;  %s1214_s29 = scalar_lea.vmem %s1306_s3, %s1015_s26 }
  0x10   : > { %v1000_v12 = vld [vmem:[%s1304_s1 + $0x48] sm:$0xff]  ;;  %v213_v13 = vpack.c.bf16 %v212_v11, %v211_v10  ;;  %v1002_v14 = vld [vmem:[%s1304_s1 + $0x58] sm:$0xff]  ;;  %v1003_v15 = vld [vmem:[%s1304_s1 + $0x60] sm:$0xff] }
  0x11   : > { %245 = vmatpush.bf16.msra.mxu0 %v991_v4  ;;  %286 = vmatpush.bf16.msra.mxu1 %v993_v5  ;;  %v1005_v16 = vld [vmem:[%s1304_s1 + $0x70] sm:$0xff]  ;;  %v1012_v17 = vld [vmem:[%s1304_s1 + $0xa8] sm:$0xff]  ;;  %v1014_v18 = vld [vmem:[%s1304_s1 + $0xb8] sm:$0xff] }
  0x12   : > { %327 = vmatpush.bf16.msra.mxu2 %v995_v6  ;;  %368 = vmatpush.bf16.msra.mxu3 %v997_v7  ;;  %v999_v19 = vld [vmem:[%s1304_s1 + $0x40] sm:$0xff]  ;;  %v1001_v20 = vld [vmem:[%s1304_s1 + $0x50] sm:$0xff]  ;;  %v1008_v21 = vld [vmem:[%s1304_s1 + $0x88] sm:$0xff] }
  0x13   : > { %v1010_v22 = vld [vmem:[%s1304_s1 + $0x98] sm:$0xff]  ;;  %v1011_v23 = vld [vmem:[%s1304_s1 + $0xa0] sm:$0xff]  ;;  %v1013_v24 = vld [vmem:[%s1304_s1 + $0xb0] sm:$0xff] }
  0x14   : > { %811 = vmatmul.msk.bf16.vlgmr.msra.gmra.mxu0 %vm234_vm0, %v213_v13  ;;  %825 = vmatmul.msk.bf16.vlgmr.msra.gmra.mxu1 %vm234_vm0, %v213_v13  ;;  %v1007_v25 = vld [vmem:[%s1304_s1 + $0x80] sm:$0xff]  ;;  %v1009_v26 = vld [vmem:[%s1304_s1 + $0x90] sm:$0xff] }
  0x15   : > { %841 = vmatmul.msk.bf16.vlgmr.msra.gmra.mxu2 %vm234_vm0, %v213_v13  ;;  %857 = vmatmul.msk.bf16.vlgmr.msra.gmra.mxu3 %vm234_vm0, %v213_v13  ;;  %v1040_v27 = vld [vmem:[%s1305_s2] ss:$0 sm:$0xff]  ;;  %v1041_v28 = vld [vmem:[%s1305_s2 + $0x1] ss:$0 sm:$0xff]  ;;  %v1042_v35 = vld [vmem:[%s1305_s2 + $0x2] ss:$0 sm:$0xff] }
  0x16   : > { %490 = vmatpush.bf16.msrb.mxu2 %v1004_v8  ;;  %531 = vmatpush.bf16.msrb.mxu3 %v1006_v9  ;;  %v1043_v36 = vld [vmem:[%s1305_s2 + $0x3] ss:$0 sm:$0xff]  ;;  %v1044_v49 = vld [vmem:[%s1305_s2 + $0x4] ss:$0 sm:$0xff]  ;;  %v1045_v50 = vld [vmem:[%s1305_s2 + $0x5] ss:$0 sm:$0xff] }
  0x17   : > { %408 = vmatpush.bf16.msrb.mxu0 %v1000_v12  ;;  %449 = vmatpush.bf16.msrb.mxu1 %v1002_v14  ;;  %v1046_v63 = vld [vmem:[%s1305_s2 + $0x6] ss:$0 sm:$0xff]  ;;  %v1047_v0 = vld [vmem:[%s1305_s2 + $0x7] ss:$0 sm:$0xff]  ;;  %v1049_v14 = vld [vmem:[%s1305_s2 + $0x9] ss:$0 sm:$0xff] }
  0x1a   : > { %491 = vmatpush.bf16.msrb.mxu2 %v1003_v15  ;;  %532 = vmatpush.bf16.msrb.mxu3 %v1005_v16 }
  0x1b   : > { %409 = vmatpush.bf16.msrb.mxu0 %v999_v19  ;;  %450 = vmatpush.bf16.msrb.mxu1 %v1001_v20 }
  0x1e   : > { %654 = vmatpush.bf16.msra.mxu2 %v1012_v17  ;;  %695 = vmatpush.bf16.msra.mxu3 %v1014_v18 }
  0x1f   : > { %572 = vmatpush.bf16.msra.mxu0 %v1008_v21  ;;  %613 = vmatpush.bf16.msra.mxu1 %v1010_v22 }
  0x22   : > { %655 = vmatpush.bf16.msra.mxu2 %v1011_v23  ;;  %696 = vmatpush.bf16.msra.mxu3 %v1013_v24 }
  0x23   : > { %573 = vmatpush.bf16.msra.mxu0 %v1007_v25  ;;  %614 = vmatpush.bf16.msra.mxu1 %v1009_v26 }
  0x24   : > { %873 = vmatmul.msk.bf16.vlgmr.msrb.gmra.mxu0 %vm234_vm0, %v213_v13  ;;  %889 = vmatmul.msk.bf16.vlgmr.msrb.gmra.mxu1 %vm234_vm0, %v213_v13 }
  0x25   : > { %905 = vmatmul.msk.bf16.vlgmr.msrb.gmra.mxu2 %vm234_vm0, %v213_v13  ;;  %921 = vmatmul.msk.bf16.vlgmr.msrb.gmra.mxu3 %vm234_vm0, %v213_v13 }
  0x34   : > { %937 = vmatmul.msk.bf16.vlgmr.msra.gmra.mxu0 %vm234_vm0, %v213_v13  ;;  %953 = vmatmul.msk.bf16.vlgmr.msra.gmra.mxu1 %vm234_vm0, %v213_v13 }
  0x35   : > { %969 = vmatmul.msk.bf16.vlgmr.msra.gmra.mxu2 %vm234_vm0, %v213_v13  ;;  %985 = vmatmul.msk.bf16.vlgmr.msra.gmra.mxu3 %vm234_vm0, %v213_v13  ;;  %v1048_v13 = vld [vmem:[%s1305_s2 + $0x8] ss:$0 sm:$0xff] }
  0x91   : > { %v247_v29 = vpop.f32.mrf.mxu0  ;;  %v288_v30 = vpop.f32.mrf.mxu1 }
  0x92   : > { %v248_v31 = vadd.f32 %v1040_v27, %v247_v29  ;;  %v289_v32 = vadd.f32 %v1041_v28, %v288_v30 }
  0x94   : > { %v252_v33 = vpack.c.bf16 %v248_v31, %v248_v31  ;;  %v293_v34 = vpack.c.bf16 %v289_v32, %v289_v32 }
  0x96   : > { %255 = vst.msk [vmem:[%s1214_s29] sm:$0xf] %vm254_vm1, %v252_v33 }
  0x97   : > { %826 = vst.msk [vmem:[%s1214_s29 + $0x8] sm:$0xf] %vm254_vm1, %v293_v34 }
  0x98   : > { %v329_v37 = vpop.f32.mrf.mxu2  ;;  %v370_v38 = vpop.f32.mrf.mxu3 }
  0x99   : > { %v330_v39 = vadd.f32 %v1042_v35, %v329_v37  ;;  %v371_v40 = vadd.f32 %v1043_v36, %v370_v38  ;;  %v249_v41 = vpop.f32.mrf.mxu0  ;;  %v290_v42 = vpop.f32.mrf.mxu1 }
  0x9a   : > { %v250_v43 = vadd.f32 %v1040_v27, %v249_v41  ;;  %v291_v44 = vadd.f32 %v1041_v28, %v290_v42  ;;  %v1050_v27 = vld [vmem:[%s1305_s2 + $0xa] ss:$0 sm:$0xff]  ;;  %v1051_v28 = vld [vmem:[%s1305_s2 + $0xb] ss:$0 sm:$0xff] }
  0x9b   : > { %v334_v45 = vpack.c.bf16 %v330_v39, %v330_v39  ;;  %v375_v46 = vpack.c.bf16 %v371_v40, %v371_v40 }
  0x9c   : > { %v253_v47 = vpack.c.bf16 %v250_v43, %v250_v43  ;;  %v294_v48 = vpack.c.bf16 %v291_v44, %v291_v44 }
  0x9d   : > { %842 = vst.msk [vmem:[%s1214_s29 + $0x10] sm:$0xf] %vm254_vm1, %v334_v45 }
  0x9e   : > { %858 = vst.msk [vmem:[%s1214_s29 + $0x18] sm:$0xf] %vm254_vm1, %v375_v46 }
  0x9f   : > { %256 = vst.msk [vmem:[%s1214_s29 + $0x4] sm:$0xf] %vm254_vm1, %v253_v47 }
  0xa0   : > { %827 = vst.msk [vmem:[%s1214_s29 + $0xc] sm:$0xf] %vm254_vm1, %v294_v48  ;;  %v331_v51 = vpop.f32.mrf.mxu2  ;;  %v372_v52 = vpop.f32.mrf.mxu3 }
  0xa1   : > { %v332_v53 = vadd.f32 %v1042_v35, %v331_v51  ;;  %v373_v54 = vadd.f32 %v1043_v36, %v372_v52  ;;  %v411_v55 = vpop.f32.mrf.mxu0  ;;  %v452_v56 = vpop.f32.mrf.mxu1 }
  0xa2   : > { %v412_v57 = vadd.f32 %v1044_v49, %v411_v55  ;;  %v453_v58 = vadd.f32 %v1045_v50, %v452_v56 }
  0xa3   : > { %v335_v59 = vpack.c.bf16 %v332_v53, %v332_v53  ;;  %v376_v60 = vpack.c.bf16 %v373_v54, %v373_v54 }
  0xa4   : > { %v416_v61 = vpack.c.bf16 %v412_v57, %v412_v57  ;;  %v457_v62 = vpack.c.bf16 %v453_v58, %v453_v58 }
  0xa5   : > { %843 = vst.msk [vmem:[%s1214_s29 + $0x14] sm:$0xf] %vm254_vm1, %v335_v59 }
  0xa6   : > { %859 = vst.msk [vmem:[%s1214_s29 + $0x1c] sm:$0xf] %vm254_vm1, %v376_v60 }
  0xa7   : > { %874 = vst.msk [vmem:[%s1214_s29 + $0x20] sm:$0xf] %vm254_vm1, %v416_v61 }
  0xa8   : > { %890 = vst.msk [vmem:[%s1214_s29 + $0x28] sm:$0xf] %vm254_vm1, %v457_v62  ;;  %v493_v1 = vpop.f32.mrf.mxu2  ;;  %v534_v2 = vpop.f32.mrf.mxu3 }
  0xa9   : > { %v494_v3 = vadd.f32 %v1046_v63, %v493_v1  ;;  %v535_v4 = vadd.f32 %v1047_v0, %v534_v2  ;;  %v413_v5 = vpop.f32.mrf.mxu0  ;;  %v454_v6 = vpop.f32.mrf.mxu1 }
  0xaa   : > { %v414_v7 = vadd.f32 %v1044_v49, %v413_v5  ;;  %v455_v8 = vadd.f32 %v1045_v50, %v454_v6 }
  0xab   : > { %v498_v9 = vpack.c.bf16 %v494_v3, %v494_v3  ;;  %v539_v10 = vpack.c.bf16 %v535_v4, %v535_v4 }
  0xac   : > { %v417_v11 = vpack.c.bf16 %v414_v7, %v414_v7  ;;  %v458_v12 = vpack.c.bf16 %v455_v8, %v455_v8 }
  0xad   : > { %906 = vst.msk [vmem:[%s1214_s29 + $0x30] sm:$0xf] %vm254_vm1, %v498_v9 }
  0xae   : > { %922 = vst.msk [vmem:[%s1214_s29 + $0x38] sm:$0xf] %vm254_vm1, %v539_v10 }
  0xaf   : > { %875 = vst.msk [vmem:[%s1214_s29 + $0x24] sm:$0xf] %vm254_vm1, %v417_v11 }
  0xb0   : > { %891 = vst.msk [vmem:[%s1214_s29 + $0x2c] sm:$0xf] %vm254_vm1, %v458_v12  ;;  %v495_v15 = vpop.f32.mrf.mxu2  ;;  %v536_v16 = vpop.f32.mrf.mxu3 }
  0xb1   : > { %v496_v17 = vadd.f32 %v1046_v63, %v495_v15  ;;  %v537_v18 = vadd.f32 %v1047_v0, %v536_v16  ;;  %v575_v19 = vpop.f32.mrf.mxu0  ;;  %v616_v20 = vpop.f32.mrf.mxu1 }
  0xb2   : > { %v576_v21 = vadd.f32 %v1048_v13, %v575_v19  ;;  %v617_v22 = vadd.f32 %v1049_v14, %v616_v20 }
  0xb3   : > { %v499_v23 = vpack.c.bf16 %v496_v17, %v496_v17  ;;  %v540_v24 = vpack.c.bf16 %v537_v18, %v537_v18 }
  0xb4   : > { %v580_v25 = vpack.c.bf16 %v576_v21, %v576_v21  ;;  %v621_v26 = vpack.c.bf16 %v617_v22, %v617_v22 }
  0xb5   : > { %907 = vst.msk [vmem:[%s1214_s29 + $0x34] sm:$0xf] %vm254_vm1, %v499_v23 }
  0xb6   : > { %923 = vst.msk [vmem:[%s1214_s29 + $0x3c] sm:$0xf] %vm254_vm1, %v540_v24 }
  0xb7   : > { %938 = vst.msk [vmem:[%s1214_s29 + $0x40] sm:$0xf] %vm254_vm1, %v580_v25 }
  0xb8   : > { %954 = vst.msk [vmem:[%s1214_s29 + $0x48] sm:$0xf] %vm254_vm1, %v621_v26  ;;  %v657_v29 = vpop.f32.mrf.mxu2  ;;  %v698_v30 = vpop.f32.mrf.mxu3 }
  0xb9   : > { %v658_v31 = vadd.f32 %v1050_v27, %v657_v29  ;;  %v699_v32 = vadd.f32 %v1051_v28, %v698_v30  ;;  %v577_v33 = vpop.f32.mrf.mxu0  ;;  %v618_v34 = vpop.f32.mrf.mxu1 }
  0xba   : > { %v578_v35 = vadd.f32 %v1048_v13, %v577_v33  ;;  %v619_v36 = vadd.f32 %v1049_v14, %v618_v34 }
  0xbb   : > { %v662_v37 = vpack.c.bf16 %v658_v31, %v658_v31  ;;  %v703_v38 = vpack.c.bf16 %v699_v32, %v699_v32 }
  0xbc   : > { %v581_v39 = vpack.c.bf16 %v578_v35, %v578_v35  ;;  %v622_v40 = vpack.c.bf16 %v619_v36, %v619_v36 }
  0xbd   : > { %970 = vst.msk [vmem:[%s1214_s29 + $0x50] sm:$0xf] %vm254_vm1, %v662_v37 }
  0xbe   : > { %986 = vst.msk [vmem:[%s1214_s29 + $0x58] sm:$0xf] %vm254_vm1, %v703_v38 }
  0xbf   : > { %939 = vst.msk [vmem:[%s1214_s29 + $0x44] sm:$0xf] %vm254_vm1, %v581_v39 }
  0xc0   : > { %955 = vst.msk [vmem:[%s1214_s29 + $0x4c] sm:$0xf] %vm254_vm1, %v622_v40  ;;  %v659_v41 = vpop.f32.mrf.mxu2  ;;  %v700_v42 = vpop.f32.mrf.mxu3 }
  0xc1   : > { %v660_v43 = vadd.f32 %v1050_v27, %v659_v41  ;;  %v701_v44 = vadd.f32 %v1051_v28, %v700_v42 }
  0xc3   : > { %v663_v45 = vpack.c.bf16 %v660_v43, %v660_v43  ;;  %v704_v46 = vpack.c.bf16 %v701_v44, %v701_v44 }
  0xc5   : > { %971 = vst.msk [vmem:[%s1214_s29 + $0x54] sm:$0xf] %vm254_vm1, %v663_v45 }
  0xc6   : > { %987 = vst.msk [vmem:[%s1214_s29 + $0x5c] sm:$0xf] %vm254_vm1, %v704_v46 }
  0xc7 PF: > { %s13_s14 = sadd.s32 1, %s1074_s14   ;;  %s1307_s12 = smov %s1070_s13 }
  0xc8   : > { %p10_p5 = scmp.ge.s32.totalorder %s13_s14, 4   ;;  %s1308_s13 = smov %s1310_s15 }
  0xca   :  { %12 = sbr.rel (!%p10_p5) target bundleno = 2 (0x2), region = 95 }

</bundles_post_ra>
